<compile_context>
chip_gen: v6e
topology: v6e:2x2x1
jax: 0.10.0
libtpu: 0.0.40
codegen_flags: <defaults>
</compile_context>

<pallas_src>
import functools

import jax
import jax.numpy as jnp
from jax.experimental import pallas as pl
from jax.experimental.pallas import tpu as pltpu


def _ceil8(n):
    return -(-n // 8) * 8


def _actor_critic_kernel(x_ref, p_ref, out_ref, *, F, A, W, S1, SW):
    """Fused 2-layer MLP + (actor|critic) head + lane-masked softmax.

    Packed slab p_ref (all sections full lane width W, zero-padded, and
    starting on 8-row boundaries):
      rows [0,        S1)        : w1  (F, W)   data in rows 0:F
      rows [S1,       S1+SW)     : w2  (W, W)   data in rows 0:H, cols 0:H2
      rows [S1+SW,    S1+2*SW)   : wh  (W, W)   fused actor|critic, cols 0:A+1
      row   S1+2*SW              : b1  (1, W)
      row   S1+2*SW+1            : b2  (1, W)
      row   S1+2*SW+2            : bh  (1, W)   fused actor|critic biases
    """
    x = x_ref[...]                              # (B, F)
    P = p_ref[...]                              # (rows, W)

    off_b = S1 + 2 * SW
    w1 = P[0:F, :]                              # (F, W)  starts at sublane 0
    w2 = P[S1:S1 + W, :]                        # (W, W)  row-aligned, full width
    wh = P[S1 + SW:S1 + SW + W, :]              # (W, W)
    b1 = P[off_b:off_b + 1, :]                  # (1, W)
    b2 = P[off_b + 1:off_b + 2, :]
    bh = P[off_b + 2:off_b + 3, :]

    # fc1 + ReLU (padded cols of w1/b1 are zero -> padded cols of h1 are zero)
    h1 = jnp.maximum(jnp.dot(x, w1, preferred_element_type=jnp.float32) + b1, 0.0)
    # fc2 + ReLU (padded rows/cols of w2 are zero -> padded cols of h2 are zero)
    h2 = jnp.maximum(jnp.dot(h1, w2, preferred_element_type=jnp.float32) + b2, 0.0)
    # fused heads: lanes [0,A) = actor logits, lane A = state value, rest = 0
    heads = jnp.dot(h2, wh, preferred_element_type=jnp.float32) + bh      # (B, W)

    # lane-masked softmax over the action lanes only
    col = jax.lax.broadcasted_iota(jnp.int32, heads.shape, 1)
    is_action = col < A
    masked = jnp.where(is_action, heads, jnp.float32(-1e30))
    m = jnp.max(masked, axis=1, keepdims=True)
    e = jnp.exp(masked - m)                     # non-action lanes underflow to 0
    d = jnp.sum(e, axis=1, keepdims=True)
    inv = pl.reciprocal(d, approx=True)         # EUP slot
    inv = inv * (2.0 - d * inv)                 # one Newton step -> f32 accuracy

    # single full-tile store: probs in action lanes, value (and zeros) elsewhere
    out_ref[...] = jnp.where(is_action, e * inv, heads)


def pack_params(params):
    """Build the aligned parameter slab ONCE per parameter update (hoisted)."""
    F, H = params["w1"].shape
    H2 = params["w2"].shape[1]
    A = params["wa"].shape[1]
    W = max(H, H2, A + 1)
    S1 = _ceil8(F)
    SW = _ceil8(W)
    rows = S1 + 2 * SW + 8                      # trailing 8-row tile for biases

    wh = jnp.concatenate([params["wa"], params["wc"]], axis=1)   # (H2, A+1)
    bh = jnp.concatenate([params["ba"], params["bc"]], axis=1)   # (1,  A+1)

    slab = jnp.zeros((rows, W), jnp.float32)

    def place(s, r0, a):
        return s.at[r0:r0 + a.shape[0], 0:a.shape[1]].set(a.astype(jnp.float32))

    slab = place(slab, 0, params["w1"])
    slab = place(slab, S1, params["w2"])
    slab = place(slab, S1 + SW, wh)
    off_b = S1 + 2 * SW
    slab = place(slab, off_b, params["b1"])
    slab = place(slab, off_b + 1, params["b2"])
    slab = place(slab, off_b + 2, bh)

    dims = dict(F=F, H=H, H2=H2, A=A, W=W, S1=S1, SW=SW, rows=rows)
    return slab, dims


def make_forward(dims, *, batch_block=256):
    """Returns a jitted forward(x, packed) -> (action_probs, state_value)."""
    F, A, W = dims["F"], dims["A"], dims["W"]
    S1, SW, rows = dims["S1"], dims["SW"], dims["rows"]
    kernel = functools.partial(_actor_critic_kernel, F=F, A=A, W=W, S1=S1, SW=SW)

    def forward(x, packed):
        B = x.shape[0]
        # v7x: shard a large batch across both TensorCores via a parallel grid.
        use_grid = (B % batch_block == 0) and (B >= 2 * batch_block)
        if use_grid:
            out = pl.pallas_call(
                kernel,
                out_shape=jax.ShapeDtypeStruct((B, W), jnp.float32),
                grid=(B // batch_block,),
                in_specs=[pl.BlockSpec((batch_block, F), lambda i: (i, 0)),
                          pl.BlockSpec((rows, W), lambda i: (0, 0))],
                out_specs=pl.BlockSpec((batch_block, W), lambda i: (i, 0)),
                compiler_params=pltpu.CompilerParams(
                    dimension_semantics=("parallel",)),
            )(x, packed)
        else:
            # tiny CartPole batches: grid-less, everything resident in VMEM
            vmem = pl.BlockSpec(memory_space=pltpu.MemorySpace.VMEM)
            out = pl.pallas_call(
                kernel,
                out_shape=jax.ShapeDtypeStruct((B, W), jnp.float32),
                in_specs=[vmem, vmem],
                out_specs=vmem,
            )(x, packed)
        return out[:, :A], out[:, A:A + 1]

    return jax.jit(forward)


def init_params(key, num_features, num_actions, hidden_size):
    """Deterministic init mimicking nn.Linear's U(-1/sqrt(fan_in), 1/sqrt(fan_in))."""
    h2 = hidden_size // 2

    def linear(k, fan_in, fan_out):
        kw, kb = jax.random.split(k)
        bound = 1.0 / jnp.sqrt(jnp.float32(fan_in))
        w = jax.random.uniform(kw, (fan_in, fan_out), jnp.float32, -bound, bound)
        b = jax.random.uniform(kb, (1, fan_out), jnp.float32, -bound, bound)
        return w, b

    k1, k2, k3, k4 = jax.random.split(key, 4)
    w1, b1 = linear(k1, num_features, hidden_size)
    w2, b2 = linear(k2, hidden_size, h2)
    wa, ba = linear(k3, h2, num_actions)
    wc, bc = linear(k4, h2, 1)
    return {"w1": w1, "b1": b1, "w2": w2, "b2": b2,
            "wa": wa, "ba": ba, "wc": wc, "bc": bc}


def _reference_forward(x, p):
    h1 = jnp.maximum(x @ p["w1"] + p["b1"], 0.0)
    h2 = jnp.maximum(h1 @ p["w2"] + p["b2"], 0.0)
    logits = h2 @ p["wa"] + p["ba"]
    probs = jax.nn.softmax(logits, axis=1)
    value = h2 @ p["wc"] + p["bc"]
    return probs, value


if __name__ == "__main__":
    # CartPole-v1: 4 observation features, 2 discrete actions.
    B, num_features, num_actions, hidden_size = 8, 4, 2, 32

    key = jax.random.PRNGKey(0)
    kx, kp = jax.random.split(key)
    x = jax.random.normal(kx, (B, num_features), dtype=jnp.float32)
    params = init_params(kp, num_features, num_actions, hidden_size)

    # pack once (per parameter update), outside the per-step forward path
    packed, dims = pack_params(params)
    packed = jax.block_until_ready(packed)
    forward = make_forward(dims)

    probs, value = forward(x, packed)
    jax.block_until_ready((probs, value))

    # silent self-check against a pure-JAX reference
    ref_probs, ref_value = _reference_forward(x, params)
    assert probs.shape == (B, num_actions) and value.shape == (B, 1)
    assert jnp.allclose(probs, ref_probs, atol=1e-5, rtol=1e-5)
    assert jnp.allclose(value, ref_value, atol=1e-5, rtol=1e-5)
    assert jnp.allclose(jnp.sum(probs, axis=1), 1.0, atol=1e-5)

    print("KERNEL_OK")
</pallas_src>

<mosaic_0001>
module attributes {stable_mosaic.version = 11 : i64} {
  func.func @_actor_critic_kernel(%arg0: memref<8x4xf32, #tpu.memory_space<vmem>>, %arg1: memref<80x32xf32, #tpu.memory_space<vmem>>, %arg2: memref<8x32xf32, #tpu.memory_space<vmem>>) attributes {dimension_semantics = [], scalar_prefetch = 0 : i64, scratch_operands = 0 : i64, tpu.core_type = #tpu.core_type<tc>} {
    %c0 = arith.constant 0 : index
    %c0_0 = arith.constant 0 : index
    %0 = vector.load %arg0[%c0, %c0_0] : memref<8x4xf32, #tpu.memory_space<vmem>>, vector<8x4xf32>
    %c0_1 = arith.constant 0 : index
    %c0_2 = arith.constant 0 : index
    %1 = vector.load %arg1[%c0_1, %c0_2] : memref<80x32xf32, #tpu.memory_space<vmem>>, vector<80x32xf32>
    %2 = vector.extract_strided_slice %1 {offsets = [0, 0], sizes = [4, 32], strides = [1, 1]} : vector<80x32xf32> to vector<4x32xf32>
    %3 = vector.extract_strided_slice %1 {offsets = [8, 0], sizes = [32, 32], strides = [1, 1]} : vector<80x32xf32> to vector<32x32xf32>
    %4 = vector.extract_strided_slice %1 {offsets = [40, 0], sizes = [32, 32], strides = [1, 1]} : vector<80x32xf32> to vector<32x32xf32>
    %5 = vector.extract_strided_slice %1 {offsets = [72, 0], sizes = [1, 32], strides = [1, 1]} : vector<80x32xf32> to vector<1x32xf32>
    %6 = vector.extract_strided_slice %1 {offsets = [73, 0], sizes = [1, 32], strides = [1, 1]} : vector<80x32xf32> to vector<1x32xf32>
    %7 = vector.extract_strided_slice %1 {offsets = [74, 0], sizes = [1, 32], strides = [1, 1]} : vector<80x32xf32> to vector<1x32xf32>
    %cst = arith.constant dense<0.000000e+00> : vector<8x32xf32>
    %8 = tpu.matmul %0, %2, %cst {dimension_numbers = #tpu.dot_dimension_numbers<[1], [0], [0], [1], [0, 0, 1, 1], [], []>} : vector<8x4xf32>, vector<4x32xf32>, vector<8x32xf32> -> vector<8x32xf32>
    %9 = vector.broadcast %5 : vector<1x32xf32> to vector<8x32xf32>
    %10 = arith.addf %8, %9 : vector<8x32xf32>
    %cst_3 = arith.constant 0.000000e+00 : f32
    %11 = vector.broadcast %cst_3 : f32 to vector<8x32xf32>
    %12 = arith.maximumf %10, %11 : vector<8x32xf32>
    %cst_4 = arith.constant dense<0.000000e+00> : vector<8x32xf32>
    %13 = tpu.matmul %12, %3, %cst_4 {dimension_numbers = #tpu.dot_dimension_numbers<[1], [0], [0], [1], [0, 0, 1, 1], [], []>} : vector<8x32xf32>, vector<32x32xf32>, vector<8x32xf32> -> vector<8x32xf32>
    %14 = vector.broadcast %6 : vector<1x32xf32> to vector<8x32xf32>
    %15 = arith.addf %13, %14 : vector<8x32xf32>
    %cst_5 = arith.constant 0.000000e+00 : f32
    %16 = vector.broadcast %cst_5 : f32 to vector<8x32xf32>
    %17 = arith.maximumf %15, %16 : vector<8x32xf32>
    %cst_6 = arith.constant dense<0.000000e+00> : vector<8x32xf32>
    %18 = tpu.matmul %17, %4, %cst_6 {dimension_numbers = #tpu.dot_dimension_numbers<[1], [0], [0], [1], [0, 0, 1, 1], [], []>} : vector<8x32xf32>, vector<32x32xf32>, vector<8x32xf32> -> vector<8x32xf32>
    %19 = vector.broadcast %7 : vector<1x32xf32> to vector<8x32xf32>
    %20 = arith.addf %18, %19 : vector<8x32xf32>
    %21 = tpu.iota {dimensions = array<i32: 1>} : vector<8x32xi32>
    %c2_i32 = arith.constant 2 : i32
    %22 = vector.broadcast %c2_i32 : i32 to vector<8x32xi32>
    %23 = arith.cmpi slt, %21, %22 : vector<8x32xi32>
    %cst_7 = arith.constant -1.000000e+30 : f32
    %24 = vector.broadcast %cst_7 : f32 to vector<8x32xf32>
    %25 = arith.select %23, %20, %24 : vector<8x32xi1>, vector<8x32xf32>
    %cst_8 = arith.constant dense<0xFF800000> : vector<8xf32>
    %26 = vector.multi_reduction <maximumf>, %25, %cst_8 [1] : vector<8x32xf32> to vector<8xf32>
    %27 = vector.shape_cast %26 : vector<8xf32> to vector<8x1xf32>
    %28 = vector.broadcast %27 : vector<8x1xf32> to vector<8x32xf32>
    %29 = arith.subf %25, %28 : vector<8x32xf32>
    %30 = math.exp %29 : vector<8x32xf32>
    %cst_9 = arith.constant dense<0.000000e+00> : vector<8xf32>
    %31 = vector.multi_reduction <add>, %30, %cst_9 [1] : vector<8x32xf32> to vector<8xf32>
    %32 = vector.shape_cast %31 : vector<8xf32> to vector<8x1xf32>
    %33 = tpu.reciprocal %32 {approx = true} : vector<8x1xf32> -> vector<8x1xf32>
    %34 = arith.mulf %32, %33 : vector<8x1xf32>
    %cst_10 = arith.constant 2.000000e+00 : f32
    %35 = vector.broadcast %cst_10 : f32 to vector<8x1xf32>
    %36 = arith.subf %35, %34 : vector<8x1xf32>
    %37 = arith.mulf %33, %36 : vector<8x1xf32>
    %38 = vector.broadcast %37 : vector<8x1xf32> to vector<8x32xf32>
    %39 = arith.mulf %30, %38 : vector<8x32xf32>
    %40 = arith.select %23, %39, %20 : vector<8x32xi1>, vector<8x32xf32>
    %c0_11 = arith.constant 0 : index
    %c0_12 = arith.constant 0 : index
    %41 = vector.load %arg2[%c0_11, %c0_12] : memref<8x32xf32, #tpu.memory_space<vmem>>, vector<8x32xf32>
    tpu.vector_store %arg2[%c0_11, %c0_12], %40 {strides = array<i32>} : memref<8x32xf32, #tpu.memory_space<vmem>>, vector<8x32xf32>,
    return
  }
}

</mosaic_0001>

<bundles_post_ra>
// kernel: forward.1
= control target key start
LH: loop header
LB: loop body
LE: loop exit
PB: predicated region body
PF: predicated region fallthrough
CT: control target
= control target key end

     0   :  { %vm30_vm0 = vcmask 1043456   ;;  %vm26_vm1 = vcmask 31744   ;;  %v334_v0 = vmov 0.0   ;;  %vm335_vm2 = vmmov 0   ;;  %s394_s1 = inlined_call_operand.vmem [shape: f32[80,32], index: 1, kind: input, shape index: {}]   ;;  %s395_s0 = inlined_call_operand.vmem [shape: f32[8,4], index: 0, kind: input, shape index: {}]   ;;  %s396_s2 = inlined_call_operand.vmem [shape: f32[8,32], index: 2, kind: output, shape index: {}]  }
   0x1   :  { %301 = vmatprep.subr.mxu0 %v334_v0  ;;  %v12_v1 = vld [vmem:[%s394_s1] sm:$0xff]  ;;  %303 = vmatprep.mubr.msk.f32.mxu0 %vm335_vm2, %v334_v0  ;;  %v15_v4 = vld [vmem:[%s394_s1 + $0x18] sm:$0xff]  ;;  %v14_v5 = vld [vmem:[%s394_s1 + $0x10] sm:$0xff]  ;;  %v22_v8 = vlaneseq  ;;  %vm109_vm3 = vcmask 261120  }
   0x2   :  { %v11_v2 = vld [vmem:[%s395_s0] sm:$0xff]  ;;  %302 = vmatpush3.msk.msra.mxu0 %vm30_vm0, %v12_v1  ;;  %306 = vmatprep.subr.mxu1 %v334_v0  ;;  %v13_v6 = vld [vmem:[%s394_s1 + $0x8] sm:$0xff]  ;;  %v19_v17 = vld [vmem:[%s394_s1 + $0x38] sm:$0xff] }
   0x3   :  { %v16_v3 = vld [vmem:[%s394_s1 + $0x20] sm:$0xff]  ;;  %304 = vmatmul.mubr.msk.f32.vlgmr.msra.gmra.mxu0 %vm26_vm1, %v11_v2  ;;  %314 = vmatprep.mubr.msk.f32.mxu1 %vm335_vm2, %v334_v0  ;;  %v23_v9 = vshrl.u32 %v22_v8, 7  ;;  %v21_v11 = vld [vmem:[%s394_s1 + $0x48] sm:$0xff]  ;;  %v18_v18 = vld [vmem:[%s394_s1 + $0x30] sm:$0xff]  ;;  %v262_v27 = vand.u32 127, %v22_v8 }
   0x4   :  { %307 = vmatpush3.msra.mxu1 %v16_v3  ;;  %317 = vmatprep.subr.mxu0 %v334_v0  ;;  %v20_v7 = vld [vmem:[%s394_s1 + $0x40] sm:$0xff]  ;;  %v17_v19 = vld [vmem:[%s394_s1 + $0x28] sm:$0xff] }
   0x5   :  { %308 = vmatprep.subr.mxu1 %v334_v0  ;;  %325 = vmatprep.mubr.msk.f32.mxu0 %vm335_vm2, %v334_v0  ;;  %v24_v10 = vsub.s32 0, %v23_v9  ;;  %v107_v20 = vsub.s32 1, %v23_v9  ;;  %v186_v26 = vsub.s32 2, %v23_v9  ;;  %vm263_vm4 = vcmp.lt.s32.totalorder %v262_v27, 2 }
   0x6   :  { %309 = vmatpush3.msra.mxu1 %v15_v4  ;;  %318 = vmatpush3.msra.mxu0 %v20_v7 }
   0x7   :  { %310 = vmatprep.subr.mxu1 %v334_v0  ;;  %319 = vmatprep.subr.mxu0 %v334_v0  ;;  %v25_v12 = vrot.slane %v21_v11, %v24_v10  ;;  %v108_v21 = vrot.slane %v21_v11, %v107_v20  ;;  %v187_v28 = vrot.slane %v21_v11, %v186_v26 }
   0x8   :  { %311 = vmatpush3.msra.mxu1 %v14_v5  ;;  %320 = vmatpush3.msra.mxu0 %v19_v17 }
   0x9   :  { %312 = vmatprep.subr.mxu1 %v334_v0  ;;  %321 = vmatprep.subr.mxu0 %v334_v0 }
   0xa   :  { %313 = vmatpush3.msra.mxu1 %v13_v6  ;;  %322 = vmatpush3.msra.mxu0 %v18_v18 }
   0xb   :  { %323 = vmatprep.subr.mxu0 %v334_v0 }
   0xc   :  { %324 = vmatpush3.msra.mxu0 %v17_v19 }
  0xc3   :  { %v100_v13 = vpop.f32.mrf.mxu0 }
  0xc4   :  { %v101_v14 = vadd.f32 %v100_v13, %v25_v12 }
  0xc5   :  { %v305_v15 = vpop.f32.mrf.mxu0 }
  0xc6   :  { %v104_v16 = vmax.f32 %v101_v14, 0.0 }
  0xc8   :  { %315 = vmatmul.mubr.msk.f32.vlgmr.msra.gmra.mxu1 %vm109_vm3, %v104_v16 }
 0x188   :  { %v179_v22 = vpop.f32.mrf.mxu1 }
 0x189   :  { %v180_v23 = vadd.f32 %v179_v22, %v108_v21 }
 0x18a   :  { %v316_v24 = vpop.f32.mrf.mxu1 }
 0x18b   :  { %v183_v25 = vmax.f32 %v180_v23, 0.0 }
 0x18d   :  { %326 = vmatmul.mubr.msk.f32.vlgmr.msra.gmra.mxu0 %vm109_vm3, %v183_v25 }
 0x24d   :  { %v257_v29 = vpop.f32.mrf.mxu0 }
 0x24e   :  { %v258_v30 = vadd.f32 %v257_v29, %v187_v28 }
 0x24f   :  { %v327_v31 = vpop.f32.mrf.mxu0 }
 0x250   :  { %v264_v32 = vsel %vm263_vm4, %v258_v30, -1e+30 }
 0x251   :  { %v265_v33 = vsel %vm109_vm3, %v264_v32, -inf }
 0x252   :  { %266 = vmax.xlane.f32.xlu0 %v265_v33 }
 0x2db   :  { %v267_v34 = vpop.xlane.xlu0 %266 }
 0x2dc   :  { %v268_v35 = vsub.f32 %v264_v32, %v267_v34 }
 0x2de   :  { %v269_v36 = vmul.f32 1.442695, %v268_v35 }
 0x2e0   :  { %330 = vpow2.f32 %v269_v36 }
 0x2ed   :  { %v331_v37 = vpop.eup %330 }
 0x2ee   :  { %v271_v38 = vsel %vm109_vm3, %v331_v37, 0.0 }
 0x2ef   :  { %272 = vadd.xlane.f32.xlu0 %v271_v38 }
 0x378   :  { %v273_v39 = vpop.xlane.xlu0 %272 }
 0x379   :  { %332 = vrcp.f32 %v273_v39 }
 0x386   :  { %v333_v40 = vpop.eup %332 }
 0x387   :  { %v275_v41 = vmul.f32 %v333_v40, %v273_v39 }
 0x389   :  { %v276_v42 = vsub.f32 2.0, %v275_v41 }
 0x38b   :  { %v277_v43 = vmul.f32 %v333_v40, %v276_v42 }
 0x38d   :  { %v278_v44 = vmul.f32 %v331_v37, %v277_v43 }
 0x38f   :  { %v279_v45 = vsel %vm263_vm4, %v278_v44, %v258_v30 }
 0x390   :  { %280 = vst.msk [vmem:[%s396_s2] sm:$0xff] %vm109_vm3, %v279_v45 }

</bundles_post_ra>
